<compile_context>
chip_gen: v7x
topology: tpu7x:2x2x1
jax: 0.10.0
libtpu: 0.0.40
codegen_flags: <defaults>
</compile_context>

<pallas_src>
from functools import partial

import numpy as np
import jax
import jax.numpy as jnp
from jax.experimental import pallas as pl
from jax.experimental.pallas import tpu as pltpu

# ------------------------- config (mirrors __init__) -------------------------
NUM_CLASSES = 6          # num object categories (no-object handled implicitly)
NUM_QUERIES = 4
EOS_COEF = 0.1
WEIGHT = 5.0             # self.weight (per-matched-query focal weight)
LABEL_SMOOTHING_ALPHA = 0.1
FOCAL_ALPHA = 0.25
FOCAL_GAMMA = 2.0        # gamma = 2 (hard-coded as om*om below)
INV_SIG_EPS = 1e-5
GIOU_EPS = 1e-7


# =================== fused Pallas kernel: all losses in one call ===================
def _make_kernel(C, Q, n_matched, tgt_len, inv_num_boxes):
    """Kernel over a packed lane-dense [R, N*Q] slab.

    Row layout (R = 3*C + 17 + Q):
      [0      : C     )  logits              (class logits, per lane = (frame, query))
      [C      : 2C    )  smoothed focal targets
      [2C     : 2C+3  )  binary (3-way) logits
      [2C+3   : 2C+6  )  binary target one-hot
      [2C+6   : 3C+6  )  class_error target one-hot (un-offset matched lanes)
      [3C+6   ]          wm   = weights * valid-frame mask * 1/(Q*valid_len)
      [3C+7   ]          cem  = class_error matched-lane mask
      [3C+8   ]          bm   = box / matched-lane mask (front-pad-offset lanes)
      [3C+9   : 3C+13 )  predicted boxes  (cxcywh on sublanes)
      [3C+13  : 3C+17 )  target boxes     (cxcywh, zero at unmatched lanes)
      [3C+17  : +Q    )  per-query lane one-hot masks (for cardinality)
    """
    R_TS, R_LB, R_OH = C, 2 * C, 2 * C + 3
    R_CEOH, R_WM, R_CEM, R_BM = 2 * C + 6, 3 * C + 6, 3 * C + 7, 3 * C + 8
    R_PB, R_TB, R_QM = 3 * C + 9, 3 * C + 13, 3 * C + 17

    inv_match = 1.0 / float(n_matched)
    tgt_len_f = float(tgt_len)
    inv_nvb = float(inv_num_boxes)

    def kernel(x_ref, out_ref):
        lg   = x_ref[0:C, :]                 # [C, NQ]
        ts   = x_ref[R_TS:R_TS + C, :]       # [C, NQ]
        lb   = x_ref[R_LB:R_LB + 3, :]       # [3, NQ]
        oh   = x_ref[R_OH:R_OH + 3, :]       # [3, NQ]
        ceoh = x_ref[R_CEOH:R_CEOH + C, :]   # [C, NQ]
        wm   = x_ref[R_WM:R_WM + 1, :]       # [1, NQ]
        cem  = x_ref[R_CEM:R_CEM + 1, :]     # [1, NQ]
        bm   = x_ref[R_BM:R_BM + 1, :]       # [1, NQ]
        pb   = x_ref[R_PB:R_PB + 4, :]       # [4, NQ]
        tb   = x_ref[R_TB:R_TB + 4, :]       # [4, NQ]
        qm   = x_ref[R_QM:R_QM + Q, :]       # [Q, NQ]

        # ---- loss_ce_b : class-weighted 3-way cross entropy (all frames, no mask) ----
        m = jnp.max(lb, axis=0, keepdims=True)
        e = jnp.exp(lb - m)
        se = jnp.sum(e, axis=0, keepdims=True)
        logp = lb - (jnp.log(se) + m)                       # log_softmax [3, NQ]
        nll = -jnp.sum(oh * logp, axis=0, keepdims=True)    # [1, NQ]
        cls_w = oh[0:1] + oh[1:2] + EOS_COEF * oh[2:3]      # per-target class weights
        loss_ce_b = jnp.sum(cls_w * nll) / jnp.sum(cls_w)

        # ---- loss_ce : sigmoid focal on inverse_sigmoid(p_b1 * sigmoid(logits)) ----
        pb1 = e[1:2] / se                                   # softmax class-1 prob (reuse exp)
        qv = jnp.clip(pb1 * jax.nn.sigmoid(lg), 0.0, 1.0)   # [C, NQ]
        x1 = jnp.maximum(qv, INV_SIG_EPS)
        x2 = jnp.maximum(1.0 - qv, INV_SIG_EPS)
        s = x1 + x2
        prob = x1 / s                                       # == sigmoid(log(x1/x2))
        # BCE-with-logits(log(x1/x2), ts) == log(s) - (ts*log(x1) + (1-ts)*log(x2))
        ce = jnp.log(s) - (ts * jnp.log(x1) + (1.0 - ts) * jnp.log(x2))
        p_t = prob * ts + (1.0 - prob) * (1.0 - ts)
        om = 1.0 - p_t
        alpha_t = FOCAL_ALPHA * ts + (1.0 - FOCAL_ALPHA) * (1.0 - ts)
        loss_ce = jnp.sum(alpha_t * ce * om * om * wm)      # wm folds weight/mask/1/(Q*vl)

        # ---- cardinality_error ----
        # argmax(-1) != C-1  <=>  max over first C-1 classes >= last-class logit
        max_rest = jnp.max(lg[0:C - 1], axis=0, keepdims=True)
        not_empty = (max_rest >= lg[C - 1:C]).astype(jnp.float32)       # [1, NQ]
        card_pred = jnp.sum(qm * not_empty, axis=1, keepdims=True)      # [Q, 1] per-query sums
        card_err = jnp.mean(jnp.abs(card_pred - tgt_len_f))

        # ---- class_error (top-1 accuracy of matched logits, un-offset lanes) ----
        max_all = jnp.max(lg, axis=0, keepdims=True)
        tgt_logit = jnp.sum(ceoh * lg, axis=0, keepdims=True)
        correct = jnp.where(tgt_logit >= max_all, 1.0, 0.0) * cem
        class_err = 100.0 - 100.0 * jnp.sum(correct) * inv_match

        # ---- boxes : L1 + GIoU (dense, masked to matched lanes) ----
        l1 = jnp.sum(jnp.abs(pb - tb) * bm)
        scx, scy, sw, sh = pb[0:1], pb[1:2], pb[2:3], pb[3:4]
        tcx, tcy, tw, th = tb[0:1], tb[1:2], tb[2:3], tb[3:4]
        sx1, sy1 = scx - 0.5 * sw, scy - 0.5 * sh
        sx2, sy2 = scx + 0.5 * sw, scy + 0.5 * sh
        tx1, ty1 = tcx - 0.5 * tw, tcy - 0.5 * th
        tx2, ty2 = tcx + 0.5 * tw, tcy + 0.5 * th
        area_s = (sx2 - sx1) * (sy2 - sy1)
        area_t = (tx2 - tx1) * (ty2 - ty1)
        iw = jnp.maximum(jnp.minimum(sx2, tx2) - jnp.maximum(sx1, tx1), 0.0)
        ih = jnp.maximum(jnp.minimum(sy2, ty2) - jnp.maximum(sy1, ty1), 0.0)
        inter = iw * ih
        union = area_s + area_t - inter
        iou = inter / jnp.maximum(union, GIOU_EPS)
        ew = jnp.maximum(jnp.maximum(sx2, tx2) - jnp.minimum(sx1, tx1), 0.0)
        eh = jnp.maximum(jnp.maximum(sy2, ty2) - jnp.minimum(sy1, ty1), 0.0)
        earea = ew * eh
        giou = iou - (earea - union) / jnp.maximum(earea, GIOU_EPS)
        giou_sum = jnp.sum((1.0 - giou) * bm)

        out_ref[0] = loss_ce
        out_ref[1] = loss_ce_b
        out_ref[2] = card_err
        out_ref[3] = class_err
        out_ref[4] = l1 * inv_nvb
        out_ref[5] = giou_sum * inv_nvb

    return kernel


# ================== on-device target construction + fused kernel call ==================
@partial(jax.jit, static_argnames=("front_pad", "valid_len", "tgt_len"))
def _criterion_jit(pred_logits, pred_logits_b, pred_boxes, gt_boxes,
                   batch_idx, src_idx, tco, *, front_pad, valid_len, tgt_len):
    f32 = jnp.float32
    B, T, Q, C = pred_logits.shape
    N = B * T
    NQ = N * Q
    M = batch_idx.shape[0]

    # lane index convention: lane = frame * Q + query
    lane_off = (front_pad + batch_idx) * Q + src_idx   # target-scatter lanes (with front_pad)
    lane_raw = batch_idx * Q + src_idx                 # un-offset lanes (weights / class_error)

    # lane-dense re-layout: [rows, N*Q]
    lg = jnp.moveaxis(pred_logits.reshape(N, Q, C).astype(f32), -1, 0).reshape(C, NQ)
    lb = jnp.moveaxis(pred_logits_b.reshape(N, Q, 3).astype(f32), -1, 0).reshape(3, NQ)
    pbx = jnp.moveaxis(pred_boxes.reshape(N, Q, 4).astype(f32), -1, 0).reshape(4, NQ)

    # 3-way binary targets: class 2 everywhere, class 1 at matched (offset) lanes
    ismo = jnp.zeros((NQ,), f32).at[lane_off].set(1.0)
    oh = jnp.stack([jnp.zeros((NQ,), f32), ismo, 1.0 - ismo], axis=0)       # [3, NQ]

    # label-smoothed focal targets over C classes
    onehot_c = jnp.zeros((C, NQ), f32).at[tco, lane_off].set(1.0)
    a = LABEL_SMOOTHING_ALPHA
    tl = (1.0 - a) + a / C
    fl = a / C
    ts = fl + (tl - fl) * onehot_c                                          # [C, NQ]

    # class_error one-hot / mask (reference gathers logits WITHOUT the front_pad offset)
    ceoh = jnp.zeros((C, NQ), f32).at[tco, lane_raw].set(1.0)
    cem = jnp.zeros((NQ,), f32).at[lane_raw].set(1.0)

    # focal weights (no front_pad offset, matches reference) * valid-frame mask * 1/(Q*vl)
    w = jnp.ones((NQ,), f32).at[lane_raw].set(WEIGHT)
    frame_idx = jnp.arange(NQ, dtype=jnp.int32) // Q
    vm = ((frame_idx >= front_pad) & (frame_idx < front_pad + valid_len)).astype(f32)
    wm = w * vm * (1.0 / (Q * valid_len))

    # dense target boxes at matched (offset) lanes
    tb4 = gt_boxes[:, 1:].astype(f32)                       # [T, 4] cxcywh
    tb_match = tb4[front_pad + batch_idx]                   # [M, 4]
    tbx = jnp.zeros((4, NQ), f32).at[:, lane_off].set(tb_match.T)

    # per-query lane masks for the cardinality per-query sums
    qm = (jnp.arange(NQ, dtype=jnp.int32)[None, :] % Q
          == jnp.arange(Q, dtype=jnp.int32)[:, None]).astype(f32)           # [Q, NQ]

    packed = jnp.concatenate([
        lg, ts, lb, oh, ceoh,
        wm[None, :], cem[None, :], ismo[None, :],
        pbx, tbx, qm], axis=0)                              # [3*C + 17 + Q, NQ]

    kernel = _make_kernel(C, Q, n_matched=M, tgt_len=tgt_len,
                          inv_num_boxes=1.0 / valid_len)
    return pl.pallas_call(
        kernel,
        out_shape=jax.ShapeDtypeStruct((6,), f32),
        in_specs=[pl.BlockSpec(memory_space=pltpu.MemorySpace.VMEM)],
        out_specs=pl.BlockSpec(memory_space=pltpu.MemorySpace.SMEM),
    )(packed)


# ================================ forward glue ================================
def set_criterion_jhmdb_forward(outputs, targets):
    pred_logits = outputs['pred_logits']      # [B,T,Q,C]
    pred_logits_b = outputs['pred_logits_b']  # [B,T,Q,3]
    pred_boxes = outputs['pred_boxes']        # [B,T,Q,4]
    B, T, Q, C = pred_logits.shape
    assert B == 1, "per-frame matcher indices assume batch size 1 (JHMDB setting)"

    front_pad = int(targets[0]['front_pad'])
    end_pad = int(targets[0]['end_pad'])
    valid_len = T - front_pad - end_pad

    labels = np.asarray(targets[0]['labels'])
    tgt_len = int(labels.shape[0])

    # --- matcher (deterministic stand-in for the Hungarian matcher) ---
    # TODO(synk): Hungarian assignment (scipy linear_sum_assignment) not expressible in
    #             Pallas; fixed per-frame assignment used instead.
    valid_labels = labels[front_pad:front_pad + valid_len]
    keep = valid_labels != NUM_CLASSES
    frames = np.arange(valid_len)[keep]
    batch_idx = frames.astype(np.int32)
    src_idx = (frames % Q).astype(np.int32)
    tco = valid_labels[keep].astype(np.int32)               # matched target classes

    gt_boxes = jnp.asarray(np.asarray(targets[0]['boxes'], dtype=np.float32))  # [T,5]

    out = _criterion_jit(
        pred_logits, pred_logits_b, pred_boxes, gt_boxes,
        jnp.asarray(batch_idx), jnp.asarray(src_idx), jnp.asarray(tco),
        front_pad=front_pad, valid_len=valid_len, tgt_len=tgt_len)

    return {
        'loss_ce': out[0],
        'loss_ce_b': out[1],
        'cardinality_error': out[2],
        'class_error': out[3],
        'loss_bbox': out[4],
        'loss_giou': out[5],
    }


# ==================================== main ====================================
if __name__ == "__main__":
    key = jax.random.PRNGKey(0)
    B, T, Q, C = 1, 8, NUM_QUERIES, NUM_CLASSES
    k1, k2, k3, k4, k5 = jax.random.split(key, 5)

    outputs = {
        'pred_logits': jax.random.normal(k1, (B, T, Q, C), jnp.float32),
        'pred_logits_b': jax.random.normal(k2, (B, T, Q, 3), jnp.float32),
        'pred_boxes': jax.nn.sigmoid(jax.random.normal(k3, (B, T, Q, 4), jnp.float32)),
    }
    labels = np.asarray(jax.random.randint(k4, (T,), 0, NUM_CLASSES))          # [T]
    gt_boxes = np.concatenate(
        [np.arange(T, dtype=np.float32)[:, None],
         np.asarray(jax.random.uniform(k5, (T, 4), minval=0.2, maxval=0.4))],
        axis=1)                                                                 # [T,5]
    targets = [{'labels': labels, 'boxes': gt_boxes, 'front_pad': 1, 'end_pad': 1}]

    losses = set_criterion_jhmdb_forward(outputs, targets)
    for v in jax.tree_util.tree_leaves(losses):
        jax.block_until_ready(v)
    print("KERNEL_OK")
</pallas_src>

<mosaic_0001>
module attributes {stable_mosaic.version = 11 : i64} {
  func.func @kernel(%arg0: memref<39x32xf32, #tpu.memory_space<vmem>>, %arg1: memref<6xf32, #tpu.memory_space<smem>>) attributes {dimension_semantics = [], scalar_prefetch = 0 : i64, scratch_operands = 0 : i64, tpu.core_type = #tpu.core_type<tc>} {
    %c0 = arith.constant 0 : index
    %c0_0 = arith.constant 0 : index
    %0 = vector.load %arg0[%c0, %c0_0] : memref<39x32xf32, #tpu.memory_space<vmem>>, vector<6x32xf32>
    %c6 = arith.constant 6 : index
    %c0_1 = arith.constant 0 : index
    %1 = vector.load %arg0[%c6, %c0_1] : memref<39x32xf32, #tpu.memory_space<vmem>>, vector<6x32xf32>
    %c12 = arith.constant 12 : index
    %c0_2 = arith.constant 0 : index
    %2 = vector.load %arg0[%c12, %c0_2] : memref<39x32xf32, #tpu.memory_space<vmem>>, vector<3x32xf32>
    %c15 = arith.constant 15 : index
    %c0_3 = arith.constant 0 : index
    %3 = vector.load %arg0[%c15, %c0_3] : memref<39x32xf32, #tpu.memory_space<vmem>>, vector<3x32xf32>
    %c18 = arith.constant 18 : index
    %c0_4 = arith.constant 0 : index
    %4 = vector.load %arg0[%c18, %c0_4] : memref<39x32xf32, #tpu.memory_space<vmem>>, vector<6x32xf32>
    %c24 = arith.constant 24 : index
    %c0_5 = arith.constant 0 : index
    %5 = vector.load %arg0[%c24, %c0_5] : memref<39x32xf32, #tpu.memory_space<vmem>>, vector<1x32xf32>
    %c25 = arith.constant 25 : index
    %c0_6 = arith.constant 0 : index
    %6 = vector.load %arg0[%c25, %c0_6] : memref<39x32xf32, #tpu.memory_space<vmem>>, vector<1x32xf32>
    %c26 = arith.constant 26 : index
    %c0_7 = arith.constant 0 : index
    %7 = vector.load %arg0[%c26, %c0_7] : memref<39x32xf32, #tpu.memory_space<vmem>>, vector<1x32xf32>
    %c27 = arith.constant 27 : index
    %c0_8 = arith.constant 0 : index
    %8 = vector.load %arg0[%c27, %c0_8] : memref<39x32xf32, #tpu.memory_space<vmem>>, vector<4x32xf32>
    %c31 = arith.constant 31 : index
    %c0_9 = arith.constant 0 : index
    %9 = vector.load %arg0[%c31, %c0_9] : memref<39x32xf32, #tpu.memory_space<vmem>>, vector<4x32xf32>
    %c35 = arith.constant 35 : index
    %c0_10 = arith.constant 0 : index
    %10 = vector.load %arg0[%c35, %c0_10] : memref<39x32xf32, #tpu.memory_space<vmem>>, vector<4x32xf32>
    %cst = arith.constant dense<0xFF800000> : vector<32xf32>
    %11 = vector.multi_reduction <maximumf>, %2, %cst [0] : vector<3x32xf32> to vector<32xf32>
    %12 = vector.shape_cast %11 : vector<32xf32> to vector<1x32xf32>
    %13 = vector.broadcast %12 : vector<1x32xf32> to vector<3x32xf32>
    %14 = arith.subf %2, %13 : vector<3x32xf32>
    %15 = math.exp %14 : vector<3x32xf32>
    %cst_11 = arith.constant dense<0.000000e+00> : vector<32xf32>
    %16 = vector.multi_reduction <add>, %15, %cst_11 [0] : vector<3x32xf32> to vector<32xf32>
    %17 = vector.shape_cast %16 : vector<32xf32> to vector<1x32xf32>
    %18 = math.log %17 : vector<1x32xf32>
    %19 = arith.addf %18, %12 : vector<1x32xf32>
    %20 = vector.broadcast %19 : vector<1x32xf32> to vector<3x32xf32>
    %21 = arith.subf %2, %20 : vector<3x32xf32>
    %22 = arith.mulf %3, %21 : vector<3x32xf32>
    %cst_12 = arith.constant dense<0.000000e+00> : vector<32xf32>
    %23 = vector.multi_reduction <add>, %22, %cst_12 [0] : vector<3x32xf32> to vector<32xf32>
    %24 = vector.shape_cast %23 : vector<32xf32> to vector<1x32xf32>
    %cst_13 = arith.constant 0.000000e+00 : f32
    %25 = vector.broadcast %cst_13 : f32 to vector<1x32xf32>
    %26 = arith.subf %25, %24 : vector<1x32xf32>
    %27 = vector.extract_strided_slice %3 {offsets = [0, 0], sizes = [1, 32], strides = [1, 1]} : vector<3x32xf32> to vector<1x32xf32>
    %28 = vector.extract_strided_slice %3 {offsets = [1, 0], sizes = [1, 32], strides = [1, 1]} : vector<3x32xf32> to vector<1x32xf32>
    %29 = arith.addf %27, %28 : vector<1x32xf32>
    %30 = vector.extract_strided_slice %3 {offsets = [2, 0], sizes = [1, 32], strides = [1, 1]} : vector<3x32xf32> to vector<1x32xf32>
    %cst_14 = arith.constant 1.000000e-01 : f32
    %31 = vector.broadcast %cst_14 : f32 to vector<1x32xf32>
    %32 = arith.mulf %31, %30 : vector<1x32xf32>
    %33 = arith.addf %29, %32 : vector<1x32xf32>
    %34 = arith.mulf %33, %26 : vector<1x32xf32>
    %35 = vector.shape_cast %34 : vector<1x32xf32> to vector<1x1x32xf32>
    %cst_15 = arith.constant dense<0.000000e+00> : vector<1xf32>
    %36 = vector.multi_reduction <add>, %35, %cst_15 [1, 2] : vector<1x1x32xf32> to vector<1xf32>
    %37 = vector.shape_cast %36 : vector<1xf32> to vector<1x1x1xf32>
    %38 = vector.extract %37[0, 0, 0] : f32 from vector<1x1x1xf32>
    %39 = vector.shape_cast %33 : vector<1x32xf32> to vector<1x1x32xf32>
    %cst_16 = arith.constant dense<0.000000e+00> : vector<1xf32>
    %40 = vector.multi_reduction <add>, %39, %cst_16 [1, 2] : vector<1x1x32xf32> to vector<1xf32>
    %41 = vector.shape_cast %40 : vector<1xf32> to vector<1x1x1xf32>
    %42 = vector.extract %41[0, 0, 0] : f32 from vector<1x1x1xf32>
    %43 = arith.divf %38, %42 : f32
    %44 = vector.extract_strided_slice %15 {offsets = [1, 0], sizes = [1, 32], strides = [1, 1]} : vector<3x32xf32> to vector<1x32xf32>
    %45 = arith.divf %44, %17 : vector<1x32xf32>
    %46 = arith.negf %0 : vector<6x32xf32>
    %47 = math.exp %46 : vector<6x32xf32>
    %cst_17 = arith.constant 1.000000e+00 : f32
    %48 = vector.broadcast %cst_17 : f32 to vector<6x32xf32>
    %49 = arith.addf %48, %47 : vector<6x32xf32>
    %50 = arith.divf %48, %49 : vector<6x32xf32>
    %51 = vector.broadcast %45 : vector<1x32xf32> to vector<6x32xf32>
    %52 = arith.mulf %51, %50 : vector<6x32xf32>
    %cst_18 = arith.constant 0.000000e+00 : f32
    %cst_19 = arith.constant 1.000000e+00 : f32
    %53 = vector.broadcast %cst_18 : f32 to vector<6x32xf32>
    %54 = arith.maximumf %53, %52 : vector<6x32xf32>
    %55 = vector.broadcast %cst_19 : f32 to vector<6x32xf32>
    %56 = arith.minimumf %55, %54 : vector<6x32xf32>
    %cst_20 = arith.constant 9.99999974E-6 : f32
    %57 = vector.broadcast %cst_20 : f32 to vector<6x32xf32>
    %58 = arith.maximumf %56, %57 : vector<6x32xf32>
    %cst_21 = arith.constant 1.000000e+00 : f32
    %59 = vector.broadcast %cst_21 : f32 to vector<6x32xf32>
    %60 = arith.subf %59, %56 : vector<6x32xf32>
    %cst_22 = arith.constant 9.99999974E-6 : f32
    %61 = vector.broadcast %cst_22 : f32 to vector<6x32xf32>
    %62 = arith.maximumf %60, %61 : vector<6x32xf32>
    %63 = arith.addf %58, %62 : vector<6x32xf32>
    %64 = arith.divf %58, %63 : vector<6x32xf32>
    %65 = math.log %63 : vector<6x32xf32>
    %66 = math.log %58 : vector<6x32xf32>
    %67 = arith.mulf %1, %66 : vector<6x32xf32>
    %cst_23 = arith.constant 1.000000e+00 : f32
    %68 = vector.broadcast %cst_23 : f32 to vector<6x32xf32>
    %69 = arith.subf %68, %1 : vector<6x32xf32>
    %70 = math.log %62 : vector<6x32xf32>
    %71 = arith.mulf %69, %70 : vector<6x32xf32>
    %72 = arith.addf %67, %71 : vector<6x32xf32>
    %73 = arith.subf %65, %72 : vector<6x32xf32>
    %74 = arith.mulf %64, %1 : vector<6x32xf32>
    %cst_24 = arith.constant 1.000000e+00 : f32
    %75 = vector.broadcast %cst_24 : f32 to vector<6x32xf32>
    %76 = arith.subf %75, %64 : vector<6x32xf32>
    %cst_25 = arith.constant 1.000000e+00 : f32
    %77 = vector.broadcast %cst_25 : f32 to vector<6x32xf32>
    %78 = arith.subf %77, %1 : vector<6x32xf32>
    %79 = arith.mulf %76, %78 : vector<6x32xf32>
    %80 = arith.addf %74, %79 : vector<6x32xf32>
    %cst_26 = arith.constant 1.000000e+00 : f32
    %81 = vector.broadcast %cst_26 : f32 to vector<6x32xf32>
    %82 = arith.subf %81, %80 : vector<6x32xf32>
    %cst_27 = arith.constant 2.500000e-01 : f32
    %83 = vector.broadcast %cst_27 : f32 to vector<6x32xf32>
    %84 = arith.mulf %83, %1 : vector<6x32xf32>
    %cst_28 = arith.constant 1.000000e+00 : f32
    %85 = vector.broadcast %cst_28 : f32 to vector<6x32xf32>
    %86 = arith.subf %85, %1 : vector<6x32xf32>
    %cst_29 = arith.constant 7.500000e-01 : f32
    %87 = vector.broadcast %cst_29 : f32 to vector<6x32xf32>
    %88 = arith.mulf %87, %86 : vector<6x32xf32>
    %89 = arith.addf %84, %88 : vector<6x32xf32>
    %90 = arith.mulf %89, %73 : vector<6x32xf32>
    %91 = arith.mulf %90, %82 : vector<6x32xf32>
    %92 = arith.mulf %91, %82 : vector<6x32xf32>
    %93 = vector.broadcast %5 : vector<1x32xf32> to vector<6x32xf32>
    %94 = arith.mulf %92, %93 : vector<6x32xf32>
    %95 = vector.shape_cast %94 : vector<6x32xf32> to vector<1x6x32xf32>
    %cst_30 = arith.constant dense<0.000000e+00> : vector<1xf32>
    %96 = vector.multi_reduction <add>, %95, %cst_30 [1, 2] : vector<1x6x32xf32> to vector<1xf32>
    %97 = vector.shape_cast %96 : vector<1xf32> to vector<1x1x1xf32>
    %98 = vector.extract %97[0, 0, 0] : f32 from vector<1x1x1xf32>
    %99 = vector.extract_strided_slice %0 {offsets = [0, 0], sizes = [5, 32], strides = [1, 1]} : vector<6x32xf32> to vector<5x32xf32>
    %cst_31 = arith.constant dense<0xFF800000> : vector<32xf32>
    %100 = vector.multi_reduction <maximumf>, %99, %cst_31 [0] : vector<5x32xf32> to vector<32xf32>
    %101 = vector.shape_cast %100 : vector<32xf32> to vector<1x32xf32>
    %102 = vector.extract_strided_slice %0 {offsets = [5, 0], sizes = [1, 32], strides = [1, 1]} : vector<6x32xf32> to vector<1x32xf32>
    %103 = arith.cmpf oge, %101, %102 : vector<1x32xf32>
    %104 = arith.extui %103 : vector<1x32xi1> to vector<1x32xi32>
    %105 = arith.sitofp %104 : vector<1x32xi32> to vector<1x32xf32>
    %106 = vector.broadcast %105 : vector<1x32xf32> to vector<4x32xf32>
    %107 = arith.mulf %10, %106 : vector<4x32xf32>
    %cst_32 = arith.constant dense<0.000000e+00> : vector<4xf32>
    %108 = vector.multi_reduction <add>, %107, %cst_32 [1] : vector<4x32xf32> to vector<4xf32>
    %109 = vector.shape_cast %108 : vector<4xf32> to vector<4x1xf32>
    %cst_33 = arith.constant 8.000000e+00 : f32
    %110 = vector.broadcast %cst_33 : f32 to vector<4x1xf32>
    %111 = arith.subf %109, %110 : vector<4x1xf32>
    %112 = math.absf %111 : vector<4x1xf32>
    %113 = vector.shape_cast %112 : vector<4x1xf32> to vector<1x4x1xf32>
    %cst_34 = arith.constant dense<0.000000e+00> : vector<1xf32>
    %114 = vector.multi_reduction <add>, %113, %cst_34 [1, 2] : vector<1x4x1xf32> to vector<1xf32>
    %115 = vector.shape_cast %114 : vector<1xf32> to vector<1x1x1xf32>
    %116 = vector.extract %115[0, 0, 0] : f32 from vector<1x1x1xf32>
    %cst_35 = arith.constant 4.000000e+00 : f32
    %117 = arith.divf %116, %cst_35 : f32
    %cst_36 = arith.constant dense<0xFF800000> : vector<32xf32>
    %118 = vector.multi_reduction <maximumf>, %0, %cst_36 [0] : vector<6x32xf32> to vector<32xf32>
    %119 = vector.shape_cast %118 : vector<32xf32> to vector<1x32xf32>
    %120 = arith.mulf %4, %0 : vector<6x32xf32>
    %cst_37 = arith.constant dense<0.000000e+00> : vector<32xf32>
    %121 = vector.multi_reduction <add>, %120, %cst_37 [0] : vector<6x32xf32> to vector<32xf32>
    %122 = vector.shape_cast %121 : vector<32xf32> to vector<1x32xf32>
    %123 = arith.cmpf oge, %122, %119 : vector<1x32xf32>
    %cst_38 = arith.constant 1.000000e+00 : f32
    %cst_39 = arith.constant 0.000000e+00 : f32
    %124 = vector.broadcast %cst_38 : f32 to vector<1x32xf32>
    %125 = vector.broadcast %cst_39 : f32 to vector<1x32xf32>
    %126 = arith.select %123, %124, %125 : vector<1x32xi1>, vector<1x32xf32>
    %127 = arith.mulf %126, %6 : vector<1x32xf32>
    %128 = vector.shape_cast %127 : vector<1x32xf32> to vector<1x1x32xf32>
    %cst_40 = arith.constant dense<0.000000e+00> : vector<1xf32>
    %129 = vector.multi_reduction <add>, %128, %cst_40 [1, 2] : vector<1x1x32xf32> to vector<1xf32>
    %130 = vector.shape_cast %129 : vector<1xf32> to vector<1x1x1xf32>
    %131 = vector.extract %130[0, 0, 0] : f32 from vector<1x1x1xf32>
    %cst_41 = arith.constant 1.000000e+02 : f32
    %132 = arith.mulf %cst_41, %131 : f32
    %cst_42 = arith.constant 0.166666672 : f32
    %133 = arith.mulf %132, %cst_42 : f32
    %cst_43 = arith.constant 1.000000e+02 : f32
    %134 = arith.subf %cst_43, %133 : f32
    %135 = arith.subf %8, %9 : vector<4x32xf32>
    %136 = math.absf %135 : vector<4x32xf32>
    %137 = vector.broadcast %7 : vector<1x32xf32> to vector<4x32xf32>
    %138 = arith.mulf %136, %137 : vector<4x32xf32>
    %139 = vector.shape_cast %138 : vector<4x32xf32> to vector<1x4x32xf32>
    %cst_44 = arith.constant dense<0.000000e+00> : vector<1xf32>
    %140 = vector.multi_reduction <add>, %139, %cst_44 [1, 2] : vector<1x4x32xf32> to vector<1xf32>
    %141 = vector.shape_cast %140 : vector<1xf32> to vector<1x1x1xf32>
    %142 = vector.extract %141[0, 0, 0] : f32 from vector<1x1x1xf32>
    %143 = vector.extract_strided_slice %8 {offsets = [0, 0], sizes = [1, 32], strides = [1, 1]} : vector<4x32xf32> to vector<1x32xf32>
    %144 = vector.extract_strided_slice %8 {offsets = [1, 0], sizes = [1, 32], strides = [1, 1]} : vector<4x32xf32> to vector<1x32xf32>
    %145 = vector.extract_strided_slice %8 {offsets = [2, 0], sizes = [1, 32], strides = [1, 1]} : vector<4x32xf32> to vector<1x32xf32>
    %146 = vector.extract_strided_slice %8 {offsets = [3, 0], sizes = [1, 32], strides = [1, 1]} : vector<4x32xf32> to vector<1x32xf32>
    %147 = vector.extract_strided_slice %9 {offsets = [0, 0], sizes = [1, 32], strides = [1, 1]} : vector<4x32xf32> to vector<1x32xf32>
    %148 = vector.extract_strided_slice %9 {offsets = [1, 0], sizes = [1, 32], strides = [1, 1]} : vector<4x32xf32> to vector<1x32xf32>
    %149 = vector.extract_strided_slice %9 {offsets = [2, 0], sizes = [1, 32], strides = [1, 1]} : vector<4x32xf32> to vector<1x32xf32>
    %150 = vector.extract_strided_slice %9 {offsets = [3, 0], sizes = [1, 32], strides = [1, 1]} : vector<4x32xf32> to vector<1x32xf32>
    %cst_45 = arith.constant 5.000000e-01 : f32
    %151 = vector.broadcast %cst_45 : f32 to vector<1x32xf32>
    %152 = arith.mulf %151, %145 : vector<1x32xf32>
    %153 = arith.subf %143, %152 : vector<1x32xf32>
    %cst_46 = arith.constant 5.000000e-01 : f32
    %154 = vector.broadcast %cst_46 : f32 to vector<1x32xf32>
    %155 = arith.mulf %154, %146 : vector<1x32xf32>
    %156 = arith.subf %144, %155 : vector<1x32xf32>
    %cst_47 = arith.constant 5.000000e-01 : f32
    %157 = vector.broadcast %cst_47 : f32 to vector<1x32xf32>
    %158 = arith.mulf %157, %145 : vector<1x32xf32>
    %159 = arith.addf %143, %158 : vector<1x32xf32>
    %cst_48 = arith.constant 5.000000e-01 : f32
    %160 = vector.broadcast %cst_48 : f32 to vector<1x32xf32>
    %161 = arith.mulf %160, %146 : vector<1x32xf32>
    %162 = arith.addf %144, %161 : vector<1x32xf32>
    %cst_49 = arith.constant 5.000000e-01 : f32
    %163 = vector.broadcast %cst_49 : f32 to vector<1x32xf32>
    %164 = arith.mulf %163, %149 : vector<1x32xf32>
    %165 = arith.subf %147, %164 : vector<1x32xf32>
    %cst_50 = arith.constant 5.000000e-01 : f32
    %166 = vector.broadcast %cst_50 : f32 to vector<1x32xf32>
    %167 = arith.mulf %166, %150 : vector<1x32xf32>
    %168 = arith.subf %148, %167 : vector<1x32xf32>
    %cst_51 = arith.constant 5.000000e-01 : f32
    %169 = vector.broadcast %cst_51 : f32 to vector<1x32xf32>
    %170 = arith.mulf %169, %149 : vector<1x32xf32>
    %171 = arith.addf %147, %170 : vector<1x32xf32>
    %cst_52 = arith.constant 5.000000e-01 : f32
    %172 = vector.broadcast %cst_52 : f32 to vector<1x32xf32>
    %173 = arith.mulf %172, %150 : vector<1x32xf32>
    %174 = arith.addf %148, %173 : vector<1x32xf32>
    %175 = arith.subf %159, %153 : vector<1x32xf32>
    %176 = arith.subf %162, %156 : vector<1x32xf32>
    %177 = arith.mulf %175, %176 : vector<1x32xf32>
    %178 = arith.subf %171, %165 : vector<1x32xf32>
    %179 = arith.subf %174, %168 : vector<1x32xf32>
    %180 = arith.mulf %178, %179 : vector<1x32xf32>
    %181 = arith.minimumf %159, %171 : vector<1x32xf32>
    %182 = arith.maximumf %153, %165 : vector<1x32xf32>
    %183 = arith.subf %181, %182 : vector<1x32xf32>
    %cst_53 = arith.constant 0.000000e+00 : f32
    %184 = vector.broadcast %cst_53 : f32 to vector<1x32xf32>
    %185 = arith.maximumf %183, %184 : vector<1x32xf32>
    %186 = arith.minimumf %162, %174 : vector<1x32xf32>
    %187 = arith.maximumf %156, %168 : vector<1x32xf32>
    %188 = arith.subf %186, %187 : vector<1x32xf32>
    %cst_54 = arith.constant 0.000000e+00 : f32
    %189 = vector.broadcast %cst_54 : f32 to vector<1x32xf32>
    %190 = arith.maximumf %188, %189 : vector<1x32xf32>
    %191 = arith.mulf %185, %190 : vector<1x32xf32>
    %192 = arith.addf %177, %180 : vector<1x32xf32>
    %193 = arith.subf %192, %191 : vector<1x32xf32>
    %cst_55 = arith.constant 1.000000e-07 : f32
    %194 = vector.broadcast %cst_55 : f32 to vector<1x32xf32>
    %195 = arith.maximumf %193, %194 : vector<1x32xf32>
    %196 = arith.divf %191, %195 : vector<1x32xf32>
    %197 = arith.maximumf %159, %171 : vector<1x32xf32>
    %198 = arith.minimumf %153, %165 : vector<1x32xf32>
    %199 = arith.subf %197, %198 : vector<1x32xf32>
    %cst_56 = arith.constant 0.000000e+00 : f32
    %200 = vector.broadcast %cst_56 : f32 to vector<1x32xf32>
    %201 = arith.maximumf %199, %200 : vector<1x32xf32>
    %202 = arith.maximumf %162, %174 : vector<1x32xf32>
    %203 = arith.minimumf %156, %168 : vector<1x32xf32>
    %204 = arith.subf %202, %203 : vector<1x32xf32>
    %cst_57 = arith.constant 0.000000e+00 : f32
    %205 = vector.broadcast %cst_57 : f32 to vector<1x32xf32>
    %206 = arith.maximumf %204, %205 : vector<1x32xf32>
    %207 = arith.mulf %201, %206 : vector<1x32xf32>
    %208 = arith.subf %207, %193 : vector<1x32xf32>
    %cst_58 = arith.constant 1.000000e-07 : f32
    %209 = vector.broadcast %cst_58 : f32 to vector<1x32xf32>
    %210 = arith.maximumf %207, %209 : vector<1x32xf32>
    %211 = arith.divf %208, %210 : vector<1x32xf32>
    %212 = arith.subf %196, %211 : vector<1x32xf32>
    %cst_59 = arith.constant 1.000000e+00 : f32
    %213 = vector.broadcast %cst_59 : f32 to vector<1x32xf32>
    %214 = arith.subf %213, %212 : vector<1x32xf32>
    %215 = arith.mulf %214, %7 : vector<1x32xf32>
    %216 = vector.shape_cast %215 : vector<1x32xf32> to vector<1x1x32xf32>
    %cst_60 = arith.constant dense<0.000000e+00> : vector<1xf32>
    %217 = vector.multi_reduction <add>, %216, %cst_60 [1, 2] : vector<1x1x32xf32> to vector<1xf32>
    %218 = vector.shape_cast %217 : vector<1xf32> to vector<1x1x1xf32>
    %219 = vector.extract %218[0, 0, 0] : f32 from vector<1x1x1xf32>
    %c0_61 = arith.constant 0 : index
    %220 = memref.load %arg1[%c0_61] : memref<6xf32, #tpu.memory_space<smem>>
    memref.store %98, %arg1[%c0_61] : memref<6xf32, #tpu.memory_space<smem>>
    %c1 = arith.constant 1 : index
    %221 = memref.load %arg1[%c1] : memref<6xf32, #tpu.memory_space<smem>>
    memref.store %43, %arg1[%c1] : memref<6xf32, #tpu.memory_space<smem>>
    %c2 = arith.constant 2 : index
    %222 = memref.load %arg1[%c2] : memref<6xf32, #tpu.memory_space<smem>>
    memref.store %117, %arg1[%c2] : memref<6xf32, #tpu.memory_space<smem>>
    %c3 = arith.constant 3 : index
    %223 = memref.load %arg1[%c3] : memref<6xf32, #tpu.memory_space<smem>>
    memref.store %134, %arg1[%c3] : memref<6xf32, #tpu.memory_space<smem>>
    %cst_62 = arith.constant 0.166666672 : f32
    %224 = arith.mulf %142, %cst_62 : f32
    %c4 = arith.constant 4 : index
    %225 = memref.load %arg1[%c4] : memref<6xf32, #tpu.memory_space<smem>>
    memref.store %224, %arg1[%c4] : memref<6xf32, #tpu.memory_space<smem>>
    %cst_63 = arith.constant 0.166666672 : f32
    %226 = arith.mulf %219, %cst_63 : f32
    %c5 = arith.constant 5 : index
    %227 = memref.load %arg1[%c5] : memref<6xf32, #tpu.memory_space<smem>>
    memref.store %226, %arg1[%c5] : memref<6xf32, #tpu.memory_space<smem>>
    return
  }
}

</mosaic_0001>

<bundles_post_ra>
// kernel: _criterion_jit.1
= control target key start
LH: loop header
LB: loop body
LE: loop exit
PB: predicated region body
PF: predicated region fallthrough
CT: control target
= control target key end

     0   :  { %vm145_vm0 = vcmask 258048   ;;  %vm20_vm1 = vcmask 256000   ;;  %v94_v9 = vlaneseq  ;;  %vm134_vm2 = vcmask 259072   ;;  %s484_s0 = inlined_call_operand.vmem [shape: f32[39,32], index: 0, kind: input, shape index: {}]   ;;  %s485_s1 = inlined_call_operand.hbm [shape: f32[6], index: 1, kind: output, shape index: {}]  }
   0x1   :  { %v389_v0 = vld [vmem:[%s484_s0] sm:$0x3f]  ;;  %v395_v2 = vld [vmem:[%s484_s0 + $0xf] sm:$0x7]  ;;  %v401_v5 = vld [vmem:[%s484_s0 + $0xc] sm:$0x7] }
   0x2   :  { %v146_v1 = vsel %vm145_vm0, %v389_v0, -inf  ;;  %v52_v4 = vrot.slane %v395_v2, 1  ;;  %v55_v6 = vmul.f32 0.1, %v395_v2  ;;  %v21_v7 = vsel %vm20_vm1, %v401_v5, -inf }
   0x3   :  { %v147_v3 = vrot.slane %v146_v1, 4  ;;  %v13_v8 = vld [vmem:[%s484_s0 + $0x12] sm:$0x3f]  ;;  %v22_v13 = vrot.slane %v21_v7, 4  ;;  %vm61_vm3 = vcmask 253952   ;;  %v181_v16 = vsel %vm134_vm2, %v389_v0, -inf }
   0x4   :  { %v54_v11 = vadd.f32 %v52_v4, %v395_v2  ;;  %v57_v12 = vrot.slane %v55_v6, 2  ;;  %v188_v14 = vmul.f32 %v13_v8, %v389_v0 }
   0x5   :  { %v148_v10 = vmax.f32 %v146_v1, %v147_v3 }
   0x7   :  { %v149_v15 = vrot.slane %v148_v10, 2 }
   0x8   :  { %6 = vsyncpa [#allocation3], 0  ;;  %v413_v17 = vadd.f32 %v57_v12, %v54_v11  ;;  %v23_v18 = vmax.f32 %v21_v7, %v22_v13  ;;  %v182_v19 = vrot.slane %v181_v16, 4  ;;  %v189_v20 = vsel %vm134_vm2, %v188_v14, 0.0  ;;  %v19_v37 = vld [vmem:[%s484_s0 + $0x23] sm:$0xf] }
   0x9   :  { %v416_v21 = vshrl.u32 %v94_v9, 7  ;;  %v150_v22 = vmax.f32 %v148_v10, %v149_v15  ;;  %v190_v23 = vrot.slane %v189_v20, 4  ;;  %v374_v38 = vmov 0.0   ;;  %v15_v49 = vld [vmem:[%s484_s0 + $0x19] sm:$0x1]  ;;  %s362_s15 = scalar_lea.hbm %s485_s1, 16 }
   0xa   :  { %v72_v24 = vsel %vm61_vm3, %v413_v17, 0.0  ;;  %v24_v25 = vrot.slane %v23_v18, 2  ;;  %v183_v26 = vmax.f32 %v181_v16, %v182_v19  ;;  %vm161_vm5 = vcmask 257024   ;;  %v17_v55 = vld [vmem:[%s484_s0 + $0x1b] sm:$0xf]  ;;  %p363_p0 = scmp.ne.s32.totalorder %s485_s1, %s362_s15  ;;  %p366_p1 = scmp.lt.u32.totalorder %s362_s15, %s485_s1 }
   0xb   :  { %v151_v27 = vrot.slane %v150_v22, 1  ;;  %73 = vadd.xlane.f32.xlu1 %v72_v24  ;;  %v191_v28 = vadd.f32 %v190_v23, %v189_v20  ;;  %v158_v32 = vsub.s32 5, %v416_v21  ;;  %v316_v54 = vmul.f32 -1.442695, %v389_v0  ;;  %v18_v56 = vld [vmem:[%s484_s0 + $0x1f] sm:$0xf] }
   0xc   :  { %v25_v29 = vmax.f32 %v23_v18, %v24_v25  ;;  %v184_v30 = vrot.slane %v183_v26, 2  ;;  %v229_v58 = vmul.f32 0.5, %v17_v55  ;;  %v235_v60 = vmul.f32 0.5, %v18_v56  ;;  %v446_v13 = vld [vmem:[%s484_s0 + $0x1a] sm:$0x1]  ;;  %p368_p2 = pnand %p366_p1, %p363_p0 }
   0xd   :  { %v152_v31 = vmax.f32 %v150_v22, %v151_v27  ;;  %v192_v33 = vrot.slane %v191_v28, 2  ;;  %v212_v9 = vsub.f32 %v17_v55, %v18_v56  ;;  %v216_v10 = vsub.s32 0, %v416_v21 }
   0xe   :  { %v26_v34 = vrot.slane %v25_v29, 1  ;;  %v185_v35 = vmax.f32 %v183_v26, %v184_v30  ;;  %v231_v63 = vrot.slane %v229_v58, 2  ;;  %v237_v1 = vrot.slane %v235_v60, 2 }
   0xf   :  { %vm153_vm4 = vcmp.ge.f32.partialorder %v152_v31, %v389_v0  ;;  %v193_v36 = vadd.f32 %v192_v33, %v191_v28  ;;  %v213_v14 = vand.u32 2147483647, %v212_v9  ;;  %v217_v15 = vrot.slane %v446_v13, %v216_v10 }
  0x10   :  { %v318_v39 = vsel %vm153_vm4, 1.0, %v374_v38  ;;  %v425_v40 = vmax.f32 %v25_v29, %v26_v34  ;;  %v186_v41 = vrot.slane %v185_v35, 1  ;;  %v233_v4 = vsub.f32 %v17_v55, %v231_v63 }
  0x11   :  { %v159_v42 = vrot.slane %v318_v39, %v158_v32  ;;  %v194_v43 = vrot.slane %v193_v36, 1  ;;  %v234_v6 = vadd.f32 %v231_v63, %v17_v55  ;;  %v239_v7 = vsub.f32 %v18_v56, %v237_v1 }
  0x12   :  { %v28_v44 = vsub.f32 %v401_v5, %v425_v40  ;;  %v187_v45 = vmax.f32 %v185_v35, %v186_v41  ;;  %v240_v8 = vadd.f32 %v237_v1, %v18_v56  ;;  %v218_v22 = vmul.f32 %v217_v15, %v213_v14 }
  0x13   :  { %v160_v46 = vmul.f32 %v159_v42, %v19_v37  ;;  %v195_v47 = vadd.f32 %v194_v43, %v193_v36  ;;  %v252_v20 = vmax.f32 %v233_v4, %v239_v7  ;;  %v265_v24 = vmin.f32 %v233_v4, %v239_v7 }
  0x14   :  { %v29_v48 = vmul.f32 1.442695, %v28_v44  ;;  %v251_v19 = vmin.f32 %v234_v6, %v240_v8  ;;  %v264_v23 = vmax.f32 %v234_v6, %v240_v8  ;;  %v450_v25 = vsel %vm161_vm5, %v218_v22, 0.0 }
  0x15   :  { %v162_v50 = vsel %vm161_vm5, %v160_v46, 0.0  ;;  %vm196_vm6 = vcmp.ge.f32.partialorder %v195_v47, %v187_v45  ;;  %v241_v26 = vsub.f32 %v234_v6, %v233_v4  ;;  %v246_v27 = vsub.f32 %v240_v8, %v239_v7 }
  0x16   :  { %163 = vadd.xlane.f32.xlu0 %v162_v50  ;;  %338 = vpow2.f32 %v29_v48  ;;  %v197_v51 = vsel %vm196_vm6, 1.0, %v374_v38  ;;  %v253_v28 = vsub.f32 %v251_v19, %v252_v20  ;;  %v266_v29 = vsub.f32 %v264_v23, %v265_v24 }
  0x17   :  { %v198_v52 = vmul.f32 %v197_v51, %v15_v49  ;;  %340 = vpow2.f32 %v316_v54  ;;  %v243_v30 = vrot.slane %v241_v26, 1  ;;  %v248_v31 = vrot.slane %v246_v27, 1 }
  0x18   :  { %v254_v32 = vmax.f32 %v253_v28, 0.0  ;;  %v267_v33 = vmax.f32 %v266_v29, 0.0  ;;  %v96_v35 = vsub.s32 1, %v416_v21  ;;  %vm167_vm7 = vcmask 3072  }
  0x19   :  { %v199_v53 = vsel %vm61_vm3, %v198_v52, 0.0  ;;  %v245_v38 = vmul.f32 %v243_v30, %v241_v26  ;;  %v250_v39 = vmul.f32 %v248_v31, %v246_v27 }
  0x1a   :  { %200 = vadd.xlane.f32.xlu1 %v199_v53  ;;  %v256_v41 = vrot.slane %v254_v32, 1  ;;  %v269_v45 = vrot.slane %v267_v33, 1 }
  0x1b   :  { %v259_v49 = vadd.f32 %v250_v39, %v245_v38 }
  0x1c   :  { %v258_v48 = vmul.f32 %v256_v41, %v254_v32  ;;  %v271_v52 = vmul.f32 %v269_v45, %v267_v33  ;;  %v317_v41 = vld [vmem:[%s484_s0 + $0x18] ss:$0 sm:$0xff] }
  0x1e   :  { %v260_v54 = vsub.f32 %v259_v49, %v258_v48 }
  0x20   :  { %v339_v57 = vpop.eup %338  ;;  %v261_v60 = vmax.f32 %v260_v54, 1e-07  ;;  %v272_v15 = vsub.f32 %v271_v52, %v260_v54 }
  0x21   :  { %v31_v59 = vsel %vm20_vm1, %v339_v57, 0.0  ;;  %v341_v11 = vpop.eup %340 }
  0x22   :  { %v32_v61 = vrot.slane %v31_v59, 4  ;;  %v91_v18 = vadd.f32 1.0, %v341_v11 }
  0x24   :  { %v33_v62 = vadd.f32 %v32_v61, %v31_v59 }
  0x26   :  { %v34_v3 = vrot.slane %v33_v62, 2 }
  0x28   :  { %v35_v0 = vadd.f32 %v34_v3, %v33_v62  ;;  %v10_v3 = vld [vmem:[%s484_s0 + $0x6] sm:$0x3f] }
  0x29   :  { %v112_v7 = vsub.f32 1.0, %v10_v3 }
  0x2a   :  { %v36_v12 = vrot.slane %v35_v0, 1 }
  0x2b   :  { %v124_v14 = vmul.f32 0.75, %v112_v7 }
  0x2c   :  { %v37_v16 = vadd.f32 %v36_v12, %v35_v0  ;;  %v123_v12 = vmul.f32 0.25, %v10_v3 }
  0x2e   :  { %342 = vlog2.f32 %v37_v16  ;;  %v125_v27 = vadd.f32 %v124_v14, %v123_v12 }
  0x2f   :  { %344 = vrcp.f32 %v37_v16 }
  0x30   :  { %346 = vrcp.f32 %v91_v18 }
  0x38   :  { %v343_v34 = vpop.eup %342 }
  0x39   :  { %v345_v36 = vpop.eup %344  ;;  %v39_v37 = vmul.f32 0.6931472, %v343_v34 }
  0x3a   :  { %v87_v42 = vmul.f32 %v345_v36, %v339_v57  ;;  %v347_v43 = vpop.eup %346  ;;  %v273_v57 = vmax.f32 %v271_v52, 1e-07 }
  0x3b   :  { %v40_v44 = vadd.f32 %v39_v37, %v425_v40 }
  0x3c   :  { %v97_v46 = vrot.slane %v87_v42, %v96_v35 }
  0x3d   :  { %v41_v47 = vsub.f32 %v401_v5, %v40_v44 }
  0x3e   :  { %v98_v50 = vmul.f32 %v347_v43, %v97_v46 }
  0x3f   :  { %v42_v51 = vmul.f32 %v41_v47, %v395_v2 }
  0x40   :  { %v99_v21 = vmax.f32 %v98_v50, 0.0 }
  0x41   :  { %v43_v53 = vsel %vm20_vm1, %v42_v51, 0.0 }
  0x42   :  { %v44_v55 = vrot.slane %v43_v53, 4  ;;  %v100_v56 = vmin.f32 %v99_v21, 1.0 }
  0x44   :  { %v45_v58 = vadd.f32 %v44_v55, %v43_v53  ;;  %v101_v59 = vmax.f32 %v100_v56, 1e-05  ;;  %v102_v40 = vsub.f32 1.0, %v100_v56 }
  0x46   :  { %v46_v61 = vrot.slane %v45_v58, 2  ;;  %v103_v62 = vmax.f32 %v102_v40, 1e-05  ;;  %348 = vlog2.f32 %v101_v59 }
  0x47   :  { %350 = vrcp.f32 %v273_v57 }
  0x48   :  { %v47_v5 = vadd.f32 %v46_v61, %v45_v58  ;;  %v104_v63 = vadd.f32 %v103_v62, %v101_v59  ;;  %352 = vlog2.f32 %v103_v62 }
  0x49   :  { %354 = vrcp.f32 %v261_v60 }
  0x4a   :  { %v48_v2 = vrot.slane %v47_v5, 1  ;;  %356 = vrcp.f32 %v104_v63 }
  0x4b   :  { %358 = vlog2.f32 %v104_v63 }
  0x4c   :  { %v49_v1 = vadd.f32 %v48_v2, %v47_v5 }
  0x4e   :  { %v50_v0 = vsub.f32 0.0, %v49_v1 }
  0x50   :  { %v349_v4 = vpop.eup %348  ;;  %v60_v6 = vmul.f32 %v413_v17, %v50_v0 }
  0x51   :  { %v351_v8 = vpop.eup %350  ;;  %v110_v9 = vmul.f32 0.6931472, %v349_v4 }
  0x52   :  { %v353_v10 = vpop.eup %352  ;;  %v62_v11 = vsel %vm61_vm3, %v60_v6, 0.0  ;;  %v275_v17 = vmul.f32 %v351_v8, %v272_v15 }
  0x53   :  { %v355_v16 = vpop.eup %354  ;;  %63 = vadd.xlane.f32.xlu0 %v62_v11  ;;  %v111_v18 = vmul.f32 %v110_v9, %v10_v3  ;;  %v114_v19 = vmul.f32 0.6931472, %v353_v10 }
  0x54   :  { %v357_v20 = vpop.eup %356  ;;  %v263_v31 = vmul.f32 %v355_v16, %v258_v48 }
  0x55   :  { %v359_v22 = vpop.eup %358  ;;  %v106_v23 = vmul.f32 %v357_v20, %v101_v59  ;;  %v115_v24 = vmul.f32 %v114_v19, %v112_v7 }
  0x56   :  { %v108_v26 = vmul.f32 0.6931472, %v359_v22  ;;  %v276_v36 = vsub.f32 %v263_v31, %v275_v17 }
  0x57   :  { %v116_v28 = vadd.f32 %v115_v24, %v111_v18  ;;  %v118_v29 = vmul.f32 %v106_v23, %v10_v3  ;;  %v119_v30 = vsub.f32 1.0, %v106_v23 }
  0x58   :  { %v277_v39 = vsub.f32 1.0, %v276_v36 }
  0x59   :  { %v117_v32 = vsub.f32 %v108_v26, %v116_v28  ;;  %v120_v33 = vmul.f32 %v119_v30, %v112_v7 }
  0x5a   :  { %v278_v44 = vmul.f32 %v277_v39, %v446_v13 }
  0x5b   :  { %v121_v34 = vadd.f32 %v120_v33, %v118_v29  ;;  %v126_v35 = vmul.f32 %v125_v27, %v117_v32 }
  0x5c   :  { %v279_v46 = vsel %vm61_vm3, %v278_v44, 0.0 }
  0x5d   :  { %v122_v37 = vsub.f32 1.0, %v121_v34 }
  0x5f   :  { %v127_v38 = vmul.f32 %v126_v35, %v122_v37 }
  0x61   :  { %v128_v42 = vmul.f32 %v127_v38, %v122_v37 }
  0x63   :  { %v133_v43 = vmul.f32 %v317_v41, %v128_v42 }
  0x65   :  { %v135_v45 = vsel %vm134_vm2, %v133_v43, 0.0 }
  0x66   :  { %136 = vadd.xlane.f32.xlu1 %v135_v45 }
  0x6a   :  { %280 = vadd.xlane.f32.xlu1 %v279_v46 }
  0x98   :  { %v74_v51 = vpop.xlane.xlu1 %73 }
  0x99   :  { %v75_v52 = vrot.slane %v74_v51, 4 }
  0x9b   :  { %v76_v21 = vadd.f32 %v75_v52, %v74_v51 }
  0x9d   :  { %v77_v53 = vrot.slane %v76_v21, 2 }
  0x9f   :  { %v78_v55 = vadd.f32 %v77_v53, %v76_v21 }
  0xa1   :  { %v79_v58 = vrot.slane %v78_v55, 1 }
  0xa3   :  { %v164_v47 = vpop.xlane.xlu0 %163  ;;  %v80_v60 = vadd.f32 %v79_v58, %v78_v55 }
  0xa4   :  { %v319_v48 = vadd.f32 -8.0, %v164_v47 }
  0xa6   :  { %v166_v49 = vand.u32 2147483647, %v319_v48 }
  0xa7   :  { %v201_v62 = vpop.xlane.xlu1 %200 }
  0xa8   :  { %v168_v50 = vsel %vm167_vm7, %v166_v49, 0.0  ;;  %v202_v7 = vrot.slane %v201_v62, 4 }
  0xa9   :  { %169 = vadd.xlane.f32.xlu0 %v168_v50 }
  0xaa   :  { %v203_v9 = vadd.f32 %v202_v7, %v201_v62 }
  0xac   :  { %v204_v11 = vrot.slane %v203_v9, 2 }
  0xad   :  { %220 = vadd.xlane.f32.xlu0 %v450_v25 }
  0xae   :  { %v205_v20 = vadd.f32 %v204_v11, %v203_v9 }
  0xb0   :  { %v206_v17 = vrot.slane %v205_v20, 1 }
  0xb2   :  { %v207_v32 = vadd.f32 %v206_v17, %v205_v20 }
  0xe0   :  { %v64_v54 = vpop.xlane.xlu0 %63 }
  0xe1   :  { %v65_v13 = vrot.slane %v64_v54, 4 }
  0xe3   :  { %v66_v56 = vadd.f32 %v65_v13, %v64_v54 }
  0xe5   :  { %v67_v57 = vrot.slane %v66_v56, 2 }
  0xe7   :  { %v68_v59 = vadd.f32 %v67_v57, %v66_v56 }
  0xe9   :  { %v69_v40 = vrot.slane %v68_v59, 1 }
  0xeb   :  { %v70_v61 = vadd.f32 %v69_v40, %v68_v59 }
  0xed   :  { %320 = vpush %v70_v61 }
  0xee   :  { %322 = vpush %v80_v60 }
  0xf3   :  { %v137_v5 = vpop.xlane.xlu1 %136 }
  0xf4   :  { %v138_v63 = vrot.slane %v137_v5, 4 }
  0xf6   :  { %v139_v25 = vadd.f32 %v138_v63, %v137_v5 }
  0xf7   :  { %v281_v8 = vpop.xlane.xlu1 %280 }
  0xf8   :  { %v140_v2 = vrot.slane %v139_v25, 2  ;;  %v282_v10 = vrot.slane %v281_v8, 4 }
  0xfa   :  { %v141_v3 = vadd.f32 %v140_v2, %v139_v25  ;;  %v283_v12 = vadd.f32 %v282_v10, %v281_v8 }
  0xfc   :  { %v142_v0 = vrot.slane %v141_v3, 1  ;;  %v284_v18 = vrot.slane %v283_v12, 2 }
  0xfe   :  { %v143_v4 = vadd.f32 %v142_v0, %v141_v3  ;;  %v285_v27 = vadd.f32 %v284_v18, %v283_v12 }
 0x100   :  { %v286_v33 = vrot.slane %v285_v27, 1 }
 0x102   :  { %v287_v36 = vadd.f32 %v286_v33, %v285_v27 }
 0x11e   :  { %s469_s0 = spop %320 }
 0x11f   :  { %s323_s28 = spop %322 }
 0x120   :  { %v82_v1 = vstv %s323_s28 }
 0x121   :  { %360 = vrcp.f32 %v82_v1 }
 0x12b   :  { %v361_v6 = vpop.eup %360 }
 0x12c   :  { %324 = vpush %v361_v6 }
 0x12d   :  { %326 = vpush %v143_v4 }
 0x136   :  { %v170_v14 = vpop.xlane.xlu0 %169 }
 0x137   :  { %v171_v15 = vrot.slane %v170_v14, 4 }
 0x139   :  { %v172_v16 = vadd.f32 %v171_v15, %v170_v14 }
 0x13a   :  { %v221_v19 = vpop.xlane.xlu0 %220 }
 0x13b   :  { %v173_v22 = vrot.slane %v172_v16, 2  ;;  %v222_v23 = vrot.slane %v221_v19, 4 }
 0x13d   :  { %v223_v24 = vadd.f32 %v222_v23, %v221_v19  ;;  %v174_v26 = vadd.f32 %v173_v22, %v172_v16 }
 0x13f   :  { %v224_v28 = vrot.slane %v223_v24, 2  ;;  %v175_v29 = vrot.slane %v174_v26, 1 }
 0x141   :  { %v225_v30 = vadd.f32 %v224_v28, %v223_v24  ;;  %v176_v31 = vadd.f32 %v175_v29, %v174_v26 }
 0x143   :  { %328 = vpush %v176_v31  ;;  %v226_v34 = vrot.slane %v225_v30, 1 }
 0x144   :  { %330 = vpush %v207_v32 }
 0x145   :  { %v227_v35 = vadd.f32 %v226_v34, %v225_v30 }
 0x147   :  { %332 = vpush %v227_v35 }
 0x148   :  { %334 = vpush %v287_v36 }
 0x15d   :  { %s325_s29 = spop %324 }
 0x15e   :  { %s85_s30 = smul.f32 %s325_s29, %s469_s0  ;;  %s327_s2 = spop %326 }
 0x15f   :  { %290 = sst [smem:[#allocation2]] %s327_s2 }
 0x160   :  { %292 = sst [smem:[#allocation2 + $0x1]] %s85_s30 }
 0x174   :  { %s329_s3 = spop %328 }
 0x175   :  { %s180_s4 = smul.f32 0.25, %s329_s3  ;;  %s331_s5 = spop %330 }
 0x176   :  { %s209_s6 = smul.f32 100.0, %s331_s5 }
 0x177   :  { %294 = sst [smem:[#allocation2 + $0x2]] %s180_s4 }
 0x178   :  { %s210_s7 = smul.f32 0.16666667, %s209_s6  ;;  %s333_s8 = spop %332 }
 0x179   :  { %s297_s9 = smul.f32 0.16666667, %s333_s8  ;;  %s335_s10 = spop %334 }
 0x17a   :  { %s211_s11 = ssub.f32 100.0, %s210_s7  ;;  %s300_s12 = smul.f32 0.16666667, %s335_s10 }
 0x17b   :  { %299 = sst [smem:[#allocation2 + $0x4]] %s297_s9 }
 0x17c   :  { %296 = sst [smem:[#allocation2 + $0x3]] %s211_s11 }
 0x17d   :  { %302 = sst [smem:[#allocation2 + $0x5]] %s300_s12 }
 0x17e   :  { %371 = shalt.err (!%p368_p2)
}
 0x17f   :  { %s375_s20 = smov [#allocation2]  }
 0x180   :  { %310 = dma.smem_to_hbm %s375_s20, 16, %s485_s1, [#allocation3]  }
 0x181   :  { %372 = dma.done.wait [#allocation3], 16  }
 0x182   :  { %373 = vsyncadd [#allocation3], 4294967280 }
 0x183   :  { %314 = sfence }
 0x184   :  { %315 = vsyncpa [#allocation3], 1 }

</bundles_post_ra>
